<compile_context>
chip_gen: v7x
topology: tpu7x:2x2x1
jax: 0.10.0
libtpu: 0.0.40
codegen_flags: <defaults>
</compile_context>

<pallas_src>
import math

import jax
import jax.numpy as jnp
from jax.experimental import pallas as pl
from jax.experimental.pallas import tpu as pltpu


def _round_up(x, m):
    return -(-x // m) * m


def _gate_kernel(x1_ref, x2_ref, v1_ref, v2_ref, c_ref, o_ref):
    """logit = x1.v1 + x2.v2 + c ; gate = sigmoid(logit) ; blend."""
    x1 = x1_ref[...]
    x2 = x2_ref[...]
    v1 = v1_ref[...].astype(jnp.float32)  # (1, Dp), broadcast over rows
    v2 = v2_ref[...].astype(jnp.float32)

    # Per-row gate logit: VPU multiplies + XLU lane reduction (f32 accumulate).
    logit = jnp.sum(
        x1.astype(jnp.float32) * v1 + x2.astype(jnp.float32) * v2,
        axis=-1, keepdims=True,
    )
    logit = logit + c_ref[0]              # scalar constant from SMEM
    gate = jax.nn.sigmoid(logit)          # EUP, (TM, 1) f32

    # Blend in the input dtype (keeps bf16 on-vreg on v6e/v7x; f32 stays f32).
    g = gate.astype(x1.dtype)
    o_ref[...] = (g * x1 + (1 - g) * x2).astype(o_ref.dtype)


def _vmem_capacity_bytes():
    try:
        cap = getattr(pltpu.get_tpu_info(), "vmem_capacity_bytes", None)
        if cap:
            return int(cap)
    except Exception:
        pass
    return 64 * 1024 * 1024  # v7x per-TC VMEM (smallest across generations)


def _pick_block_rows(m, dp, itemsize, vmem_cap):
    """Row tile: generation-aware VMEM budget, multi-MiB tiles, >=2 grid steps."""
    # Budget for the pipelined x1/x2/out tiles, leaving headroom for compiler
    # scratch and the tiny resident v1/v2 vectors.
    budget = int(vmem_cap * 0.45)
    # 3 pipelined arrays x 2 buffers each + a few f32 row temporaries.
    per_row = 6 * dp * itemsize + 12 * dp
    tm = budget // max(per_row, 1)
    # Cap each operand tile at ~8 MiB -- plenty to sit on the HBM roofline.
    tm = min(tm, (8 * 1024 * 1024) // max(dp * itemsize, 1))
    # Sublane packing: 8 rows for 4-byte, 16 for 2-byte, 32 for 1-byte dtypes.
    row_align = 8 * max(1, 4 // itemsize)
    tm = min(tm, m)
    # Guarantee >= 2 grid steps when possible (megacore sharding on v7x and
    # DMA/compute overlap on all generations).
    if m > row_align:
        tm = min(tm, _round_up(-(-m // 2), row_align))
    tm = max(row_align, (tm // row_align) * row_align)
    return int(tm)


def fusion2_gate_layer(x1, x2, w1, b1, w2, b2, *, block_rows=None):
    """Pallas implementation of Fusion2_GateLayer.forward.

    x1, x2: [..., D]  (same shape)
    w1: [D, 2D], b1: [D]   -- nn.Linear(2D, D) params (PyTorch (out, in) layout)
    w2: [1, D],  b2: [1]   -- nn.Linear(D, 1) params
    returns [..., D]
    """
    assert x1.shape == x2.shape
    D = x1.shape[-1]
    assert w1.shape == (D, 2 * D)
    assert b1.shape == (D,)
    assert w2.shape == (1, D)
    assert b2.shape == (1,)

    lead = x1.shape[:-1]
    M = math.prod(lead) if lead else 1
    dtype = x1.dtype
    itemsize = jnp.dtype(dtype).itemsize

    # ---- Algebraic collapse of the gate path (precomputed once in XLA). ----
    w2f = w2.reshape(D).astype(jnp.float32)
    v = w2f @ w1.astype(jnp.float32)                     # (2D,) = W2 @ W1
    v1 = v[:D]
    v2 = v[D:]
    c = (jnp.dot(w2f, b1.astype(jnp.float32))
         + b2.astype(jnp.float32)[0]).reshape(1)         # scalar constant

    # ---- Lane-dense layout: pad feature dim to a multiple of 128. ----------
    Dp = _round_up(D, 128)
    x1f = x1.reshape(M, D)
    x2f = x2.reshape(M, D)
    if Dp != D:
        pad = ((0, 0), (0, Dp - D))
        x1f = jnp.pad(x1f, pad)
        x2f = jnp.pad(x2f, pad)
        v1 = jnp.pad(v1, (0, Dp - D))
        v2 = jnp.pad(v2, (0, Dp - D))
    v1 = v1.reshape(1, Dp)
    v2 = v2.reshape(1, Dp)

    vmem_cap = _vmem_capacity_bytes()
    TM = (block_rows if block_rows is not None
          else _pick_block_rows(M, Dp, itemsize, vmem_cap))
    grid = (pl.cdiv(M, TM),)

    # Advisory hint: this is now a pure mem-bound elementwise/reduce kernel.
    cost = pl.CostEstimate(
        flops=7 * M * D,
        transcendentals=M,
        bytes_accessed=3 * M * Dp * itemsize + 2 * Dp * 4 + 4,
    )

    # vmem limit with headroom for compiler-internal scratch (never the full
    # physical capacity): ~51 MiB on v7x, ~100 MiB on v5e/v6e.
    vmem_limit = max(32 * 1024 * 1024,
                     min(int(vmem_cap * 0.8), 100 * 1024 * 1024))

    out = pl.pallas_call(
        _gate_kernel,
        out_shape=jax.ShapeDtypeStruct((M, Dp), dtype),
        grid=grid,
        in_specs=[
            pl.BlockSpec((TM, Dp), lambda i: (i, 0)),   # x1 row tile (pipelined)
            pl.BlockSpec((TM, Dp), lambda i: (i, 0)),   # x2 row tile (pipelined)
            pl.BlockSpec((1, Dp), lambda i: (0, 0)),    # v1, resident in VMEM
            pl.BlockSpec((1, Dp), lambda i: (0, 0)),    # v2, resident in VMEM
            pl.BlockSpec(memory_space=pltpu.MemorySpace.SMEM),  # c scalar
        ],
        out_specs=pl.BlockSpec((TM, Dp), lambda i: (i, 0)),
        compiler_params=pltpu.CompilerParams(
            dimension_semantics=("parallel",),   # shard row tiles across TCs
            vmem_limit_bytes=vmem_limit,
        ),
        cost_estimate=cost,
    )(x1f, x2f, v1, v2, c)

    if Dp != D:
        out = out[:, :D]
    return out.reshape(*lead, D)


if __name__ == "__main__":
    key = jax.random.PRNGKey(0)
    k_x1, k_x2, k_w1, k_b1, k_w2, k_b2 = jax.random.split(key, 6)

    # Small shapes consistent with the module: batch=2, seq=8, hidden=32.
    batch, seq, D = 2, 8, 32
    x1 = jax.random.normal(k_x1, (batch, seq, D), dtype=jnp.float32)
    x2 = jax.random.normal(k_x2, (batch, seq, D), dtype=jnp.float32)

    # Deterministic nn.Linear-style init: U(-1/sqrt(fan_in), 1/sqrt(fan_in)).
    bound1 = 1.0 / (2 * D) ** 0.5
    w1 = jax.random.uniform(k_w1, (D, 2 * D), dtype=jnp.float32,
                            minval=-bound1, maxval=bound1)
    b1 = jax.random.uniform(k_b1, (D,), dtype=jnp.float32,
                            minval=-bound1, maxval=bound1)
    bound2 = 1.0 / D ** 0.5
    w2 = jax.random.uniform(k_w2, (1, D), dtype=jnp.float32,
                            minval=-bound2, maxval=bound2)
    b2 = jax.random.uniform(k_b2, (1,), dtype=jnp.float32,
                            minval=-bound2, maxval=bound2)

    y = fusion2_gate_layer(x1, x2, w1, b1, w2, b2)
    y = jax.block_until_ready(y)

    # Pure-JAX reference mirroring the PyTorch forward.
    h_ref = jnp.concatenate([x1, x2], axis=-1) @ w1.T + b1
    gate_ref = jax.nn.sigmoid(jnp.sum(h_ref * w2, axis=-1, keepdims=True) + b2)
    ref = gate_ref * x1 + (1.0 - gate_ref) * x2

    assert y.shape == (batch, seq, D)
    assert jnp.allclose(y, ref, atol=1e-4, rtol=1e-4)

    print("KERNEL_OK")
</pallas_src>

<mosaic_0001>
module attributes {stable_mosaic.version = 11 : i64} {
  func.func @_gate_kernel(%arg0: i32, %arg1: memref<8x128xf32, #tpu.memory_space<vmem>>, %arg2: memref<8x128xf32, #tpu.memory_space<vmem>>, %arg3: memref<1x128xf32, #tpu.memory_space<vmem>>, %arg4: memref<1x128xf32, #tpu.memory_space<vmem>>, %arg5: memref<1xf32, #tpu.memory_space<smem>>, %arg6: memref<8x128xf32, #tpu.memory_space<vmem>>) attributes {dimension_semantics = [#tpu.dimension_semantics<parallel>], iteration_bounds = array<i64: 2>, scalar_prefetch = 0 : i64, scratch_operands = 0 : i64, tpu.core_type = #tpu.core_type<tc>, window_params = [{transform_indices = @transform_0, window_bounds = array<i64: 8, 128>}, {transform_indices = @transform_1, window_bounds = array<i64: 8, 128>}, {pipeline_mode = #tpu.pipeline_mode<synchronous>, transform_indices = @transform_2, window_bounds = array<i64: 1, 128>}, {pipeline_mode = #tpu.pipeline_mode<synchronous>, transform_indices = @transform_3, window_bounds = array<i64: 1, 128>}, {transform_indices = @transform_4, window_bounds = array<i64: 1>}, {transform_indices = @transform_5, window_bounds = array<i64: 8, 128>}]} {
    %c0 = arith.constant 0 : index
    %c0_0 = arith.constant 0 : index
    %0 = vector.load %arg1[%c0, %c0_0] : memref<8x128xf32, #tpu.memory_space<vmem>>, vector<8x128xf32>
    %c0_1 = arith.constant 0 : index
    %c0_2 = arith.constant 0 : index
    %1 = vector.load %arg2[%c0_1, %c0_2] : memref<8x128xf32, #tpu.memory_space<vmem>>, vector<8x128xf32>
    %c0_3 = arith.constant 0 : index
    %c0_4 = arith.constant 0 : index
    %2 = vector.load %arg3[%c0_3, %c0_4] : memref<1x128xf32, #tpu.memory_space<vmem>>, vector<1x128xf32>
    %c0_5 = arith.constant 0 : index
    %c0_6 = arith.constant 0 : index
    %3 = vector.load %arg4[%c0_5, %c0_6] : memref<1x128xf32, #tpu.memory_space<vmem>>, vector<1x128xf32>
    %4 = vector.broadcast %2 : vector<1x128xf32> to vector<8x128xf32>
    %5 = arith.mulf %0, %4 : vector<8x128xf32>
    %6 = vector.broadcast %3 : vector<1x128xf32> to vector<8x128xf32>
    %7 = arith.mulf %1, %6 : vector<8x128xf32>
    %8 = arith.addf %5, %7 : vector<8x128xf32>
    %cst = arith.constant dense<0.000000e+00> : vector<8xf32>
    %9 = vector.multi_reduction <add>, %8, %cst [1] : vector<8x128xf32> to vector<8xf32>
    %10 = vector.shape_cast %9 : vector<8xf32> to vector<8x1xf32>
    %c0_7 = arith.constant 0 : index
    %11 = memref.load %arg5[%c0_7] : memref<1xf32, #tpu.memory_space<smem>>
    %12 = vector.broadcast %11 : f32 to vector<8x1xf32>
    %13 = arith.addf %10, %12 : vector<8x1xf32>
    %14 = arith.negf %13 : vector<8x1xf32>
    %15 = math.exp %14 : vector<8x1xf32>
    %cst_8 = arith.constant 1.000000e+00 : f32
    %16 = vector.broadcast %cst_8 : f32 to vector<8x1xf32>
    %17 = arith.addf %16, %15 : vector<8x1xf32>
    %18 = arith.divf %16, %17 : vector<8x1xf32>
    %19 = vector.broadcast %18 : vector<8x1xf32> to vector<8x128xf32>
    %20 = arith.mulf %19, %0 : vector<8x128xf32>
    %cst_9 = arith.constant 1.000000e+00 : f32
    %21 = vector.broadcast %cst_9 : f32 to vector<8x1xf32>
    %22 = arith.subf %21, %18 : vector<8x1xf32>
    %23 = vector.broadcast %22 : vector<8x1xf32> to vector<8x128xf32>
    %24 = arith.mulf %23, %1 : vector<8x128xf32>
    %25 = arith.addf %20, %24 : vector<8x128xf32>
    %c0_10 = arith.constant 0 : index
    %c0_11 = arith.constant 0 : index
    %26 = vector.load %arg6[%c0_10, %c0_11] : memref<8x128xf32, #tpu.memory_space<vmem>>, vector<8x128xf32>
    tpu.vector_store %arg6[%c0_10, %c0_11], %25 {strides = array<i32>} : memref<8x128xf32, #tpu.memory_space<vmem>>, vector<8x128xf32>,
    return
  }
  func.func @transform_0(%arg0: i32) -> (i32, i32) {
    %c0_i32 = arith.constant 0 : i32
    %c0_i32_0 = arith.constant 0 : i32
    return %arg0, %c0_i32 : i32, i32
  }
  func.func @transform_1(%arg0: i32) -> (i32, i32) {
    %c0_i32 = arith.constant 0 : i32
    %c0_i32_0 = arith.constant 0 : i32
    return %arg0, %c0_i32 : i32, i32
  }
  func.func @transform_2(%arg0: i32) -> (i32, i32) {
    %c0_i32 = arith.constant 0 : i32
    %c0_i32_0 = arith.constant 0 : i32
    %c0_i32_1 = arith.constant 0 : i32
    return %c0_i32, %c0_i32_0 : i32, i32
  }
  func.func @transform_3(%arg0: i32) -> (i32, i32) {
    %c0_i32 = arith.constant 0 : i32
    %c0_i32_0 = arith.constant 0 : i32
    %c0_i32_1 = arith.constant 0 : i32
    return %c0_i32, %c0_i32_0 : i32, i32
  }
  func.func @transform_4(%arg0: i32) -> i32 {
    %c0_i32 = arith.constant 0 : i32
    %c0_i32_0 = arith.constant 0 : i32
    return %c0_i32 : i32
  }
  func.func @transform_5(%arg0: i32) -> (i32, i32) {
    %c0_i32 = arith.constant 0 : i32
    %c0_i32_0 = arith.constant 0 : i32
    return %arg0, %c0_i32 : i32, i32
  }
}

</mosaic_0001>

<bundles_post_ra>
// kernel: tpu_custom_call.1
= control target key start
LH: loop header
LB: loop body
LE: loop exit
PB: predicated region body
PF: predicated region fallthrough
CT: control target
= control target key end

     0   :  { %s881_s0 = inlined_call_operand.hbm [shape: f32[16,128], index: 0, kind: input, shape index: {}]   ;;  %s882_s1 = inlined_call_operand.hbm [shape: f32[16,128], index: 1, kind: input, shape index: {}]   ;;  %s883_s2 = inlined_call_operand.vmem [shape: f32[1,128], index: 2, kind: input, shape index: {}]   ;;  %s884_s3 = inlined_call_operand.vmem [shape: f32[1,128], index: 3, kind: input, shape index: {}]   ;;  %s885_s4 = inlined_call_operand.<no memory space> [shape: f32[1], index: 4, kind: input, shape index: {}]   ;;  %s886_s5 = inlined_call_operand.hbm [shape: f32[16,128], index: 5, kind: output, shape index: {}]  }
   0x1   :  { %10 = sst [smem:[#allocation2]] %s885_s4 }
   0x2   :  { %11 = vsyncpa [#allocation4], 0 }
   0x3   :  { %13 = vsyncpa [#allocation4 + $0x1], 0 }
   0x4   :  { %14 = vsyncpa [#allocation7], 0 }
   0x5   :  { %16 = vsyncpa [#allocation7 + $0x1], 0 }
   0x6   :  { %17 = vsyncpa [#allocation5], 0 }
   0x7   :  { %19 = vsyncpa [#allocation5 + $0x1], 0  ;;  %s661_s20 = smov 0   ;;  %s663_s21 = smov 0  }
   0x8   :  { %s665_s22 = smov 0   ;;  %s667_s23 = smov 0  }
   0x9 LB: > { %s682_s4 = sadd.s32 4294967295, %s623_s23   ;;  %s420_s24 = sadd.s32 4294967294, %s623_s23   ;;  %s623_s23 = sphi %s667_s23, %s905_s23   ;;  %s619_s22 = sphi %s665_s22, %s904_s22   ;;  %s615_s21 = sphi %s663_s21, %s903_s21   ;;  %s611_s20 = sphi %s661_s20, %s902_s20  }
   0xa   : > { %s686_s25 = sadd.s32 1, %s623_s23   ;;  %s32_s26 = sadd.s32 1, %s619_s22 }
   0xb   : > { %s29_s27 = ssub.s32 %s623_s23, %s686_s25  ;;  %p39_p0 = scmp.ne.s32.totalorder %s619_s22, %s615_s21 }
   0xc   : > { %p30_p1 = scmp.eq.s32.totalorder %s29_s27, 0  ;;  %p40_p2 = scmp.eq.s32.totalorder %s623_s23, 0 }
   0xd   : > { %p45_p3 = scmp.ne.s32.totalorder %s615_s21, %s611_s20  ;;  %p46_p4 = scmp.eq.s32.totalorder %s682_s4, 0 }
   0xe   : > { %s698_s28 = scalar_select %p30_p1, %s619_s22, %s32_s26  }
   0xf   : > { %p700_p5 = por %p40_p2, %p39_p0  ;;  %p704_p6 = por %p46_p4, %p45_p3 }
  0x10   : > { %p158_p7 = scmp.eq.s32.totalorder %s682_s4, 1  ;;  %p164_p8 = scmp.eq.s32.totalorder %s420_s24, 1 }
  0x11   : > { %s890_s30 = scalar_select %p704_p6, 1, 0 }
  0x12   : > { %p455_p10 = scmp.lt.s32.totalorder %s623_s23, 2  ;;  %p711_p11 = por %p158_p7, %p39_p0 }
  0x13   : > { %p715_p12 = por %p164_p8, %p45_p3  ;;  %s720_s8 = sand.u32 1, %s619_s22  }
  0x14   : > { %s891_s6 = scalar_select %p711_p11, 1, 0 }
  0x15   : > { %s892_s7 = scalar_select %p715_p12, 1, 0 }
  0x16   : > { %s424_s9 = sshll.u32 %s623_s23, 7  ;;  %s423_s10 = sshll.u32 %s720_s8, 3 }
  0x17   : > { %s729_s13 = scalar_lea.hbm %s881_s0, %s424_s9  ;;  %s197_s14 = scalar_lea.vmem [#allocation3], %s423_s10 }
  0x18   : > { %s204_s15 = sshll.u32 %s197_s14, 4  ;;  %p735_p13 = pnand %p455_p10, %p700_p5  ;;  %s739_s15 = int_to_ptr.vmem [resolvable:$true] %s204_s15 }
  0x19   : > { %s194_s17 = scalar_lea.sflag [#allocation4], %s720_s8  ;;  %s493_s18 = scalar_lea.hbm %s729_s13, 128 }
  0x1a   : > { %p494_p2 = scmp.ne.s32.totalorder %s729_s13, %s493_s18  ;;  %p495_p3 = pneg %p735_p13 }
  0x1b   : > { %s498_s26 = scalar_lea.hbm %s881_s0, 256  ;;  %p499_p5 = scmp.lt.u32.totalorder %s729_s13, %s881_s0 }
  0x1c   : > { %p496_p4 = pnand %p495_p3, %p494_p2  ;;  %p500_p8 = scmp.lt.u32.totalorder %s498_s26, %s493_s18 }
  0x1d   : > { %p502_p9 = scmp.lt.u32.totalorder %s493_s18, %s729_s13 }
  0x1e   : > { %p497_p7 = pneg %p496_p4  ;;  %p501_p10 = por %p500_p8, %p499_p5 }
  0x20   : > { %p503_p0 = por %p502_p9, %p501_p10 }
  0x22   : > { %p504_p1 = pnand %p503_p0, %p497_p7 }
  0x24   : > { %507 = shalt.err (!%p504_p1)
}
  0x25   : > { %s508_s11 = scalar_lea.vmem %s739_s15, 128  ;;  %s625_s12 = smov [#allocation3]  }
  0x26   : > { %p509_p2 = scmp.ne.s32.totalorder %s739_s15, %s508_s11  ;;  %s513_s14 = sshll.u32 %s625_s12, 4  ;;  %s514_s14 = int_to_ptr.vmem [resolvable:$false] %s513_s14 }
  0x27   : > { %s515_s19 = scalar_lea.vmem %s514_s14, 256  ;;  %p516_p11 = scmp.lt.s32.totalorder %s739_s15, %s514_s14 }
  0x28   : > { %p511_p4 = pnand %p509_p2, %p495_p3  ;;  %p517_p5 = scmp.lt.s32.totalorder %s515_s19, %s508_s11 }
  0x2a   : > { %p512_p12 = pneg %p511_p4  ;;  %p518_p8 = por %p517_p5, %p516_p11 }
  0x2c   : > { %p519_p9 = pnand %p518_p8, %p512_p12 }
  0x2e   : > { %522 = shalt.err (!%p519_p9)
}
  0x2f   : > { %447 = dma.hbm_to_vmem [thread:$0]  (!%p735_p13), %s729_s13, 128, %s739_s15, %s194_s17  }
  0x30   : > { %p894_p0 = scmp.lt.s32.totalorder %s623_s23, 3  ;;  %p895_p1 = scmp.ge.s32.totalorder %s623_s23, 1 }
  0x31   : > { %s782_s27 = scalar_lea.hbm %s882_s1, %s424_s9  ;;  %s215_s29 = scalar_lea.vmem [#allocation6], %s423_s10 }
  0x32   : > { %p773_p7 = pnand %p895_p1, %p894_p0  ;;  %s222_s11 = sshll.u32 %s215_s29, 4  ;;  %s223_s11 = int_to_ptr.vmem [resolvable:$true] %s222_s11 }
  0x33   : > { %s212_s13 = scalar_lea.sflag [#allocation7], %s720_s8  ;;  %s523_s15 = scalar_lea.hbm %s782_s27, 128 }
  0x34   : > { %s896_s18 = scalar_select %p773_p7, 1, 0 }
  0x35   : > { %p524_p11 = scmp.ne.s32.totalorder %s782_s27, %s523_s15  ;;  %s528_s9 = scalar_lea.hbm %s882_s1, 256 }
  0x36   : > { %p529_p2 = scmp.lt.u32.totalorder %s782_s27, %s882_s1  ;;  %p530_p4 = scmp.lt.u32.totalorder %s528_s9, %s523_s15 }
  0x37   : > { %p526_p12 = pnand %p524_p11, %p495_p3  ;;  %p532_p8 = scmp.lt.u32.totalorder %s523_s15, %s782_s27 }
  0x38   : > { %p531_p5 = por %p530_p4, %p529_p2 }
  0x39   : > { %p527_p10 = pneg %p526_p12 }
  0x3a   : > { %p533_p9 = por %p532_p8, %p531_p5 }
  0x3c   : > { %p534_p0 = pnand %p533_p9, %p527_p10 }
  0x3e   : > { %537 = shalt.err (!%p534_p0)
}
  0x3f   : > { %s538_s8 = scalar_lea.vmem %s223_s11, 128  ;;  %s626_s10 = smov [#allocation6]  }
  0x40   : > { %p539_p1 = scmp.ne.s32.totalorder %s223_s11, %s538_s8  ;;  %s543_s24 = sshll.u32 %s626_s10, 4  ;;  %s544_s24 = int_to_ptr.vmem [resolvable:$false] %s543_s24 }
  0x41   : > { %s545_s26 = scalar_lea.vmem %s544_s24, 256  ;;  %p546_p6 = scmp.lt.s32.totalorder %s223_s11, %s544_s24 }
  0x42   : > { %p541_p11 = pnand %p539_p1, %p495_p3  ;;  %p547_p7 = scmp.lt.s32.totalorder %s545_s26, %s538_s8 }
  0x44   : > { %p542_p12 = pneg %p541_p11  ;;  %p548_p2 = por %p547_p7, %p546_p6 }
  0x46   : > { %p549_p4 = pnand %p548_p2, %p542_p12 }
  0x48   : > { %552 = shalt.err (!%p549_p4)
}
  0x49   : > { %450 = dma.hbm_to_vmem [thread:$0]  (!%p735_p13), %s782_s27, 128, %s223_s11, %s212_s13  }
  0x4a   : > { %p897_p10 = scmp.ne.s32.totalorder %s896_s18, 0 }
  0x4b   : > { %s809_s29 = sand.u32 (!%p897_p10), 1, %s615_s21   ;;  %p898_p6 = scmp.ne.s32.totalorder (!%p897_p10), %s890_s30, 0 }
  0x4c   : > { %231 = sbr.rel (%p897_p10) target bundleno = 283 (0x11b), region = 40  ;;  %s812_s15 = sshll.u32 (!%p897_p10), %s809_s29, 3 }
  0x4d   : > { %s234_s17 = scalar_lea.sflag (!%p897_p10), [#allocation4], %s809_s29  ;;  %s237_s12 = scalar_lea.vmem (!%p897_p10), [#allocation3], %s812_s15 }
  0x53   : > { %598 = dma.done.wait (%p898_p6), %s234_s17, 128  }
  0x54   : > { %600 = vsyncadd (%p898_p6), %s234_s17, 4294967168  ;;  %s243_s16 = scalar_lea.sflag [#allocation7], %s809_s29  ;;  %s246_s18 = scalar_lea.vmem [#allocation6], %s812_s15 }
  0x55   : > { %602 = dma.done.wait (%p898_p6), %s243_s16, 128  }
  0x56   : > { %604 = vsyncadd (%p898_p6), %s243_s16, 4294967168  ;;  %v278_v0 = vld [vmem:[%s237_s12] sm:$0xff]  ;;  %v279_v1 = vld [vmem:[%s246_s18] sm:$0xff]  ;;  %s299_s14 = sld [smem:[#allocation2]]  ;;  %s435_s30 = sshll.u32 %s682_s4, 7 }
  0x57   : > { %v431_v2 = vld [vmem:[%s883_s2] ss:$0 sm:$0xff]  ;;  %s277_s19 = scalar_lea.vmem [#allocation8], %s812_s15  ;;  %s837_s26 = scalar_lea.hbm %s886_s5, %s435_s30 }
  0x58   : > { %v432_v3 = vld [vmem:[%s884_s3] ss:$0 sm:$0xff]  ;;  %v288_v4 = vmul.f32 %v431_v2, %v278_v0  ;;  %s327_s8 = sshll.u32 %s277_s19, 4  ;;  %s314_s17 = scalar_lea.sflag [#allocation5], %s809_s29  ;;  %s839_s8 = int_to_ptr.vmem [resolvable:$true] %s327_s8 }
  0x59   : > { %v295_v5 = vmul.f32 %v432_v3, %v279_v1  ;;  %s553_s12 = scalar_lea.vmem %s839_s8, 128  ;;  %p899_p3 = scmp.ne.s32.totalorder %s891_s6, 0 }
  0x5a   : > { %p554_p13 = scmp.ne.s32.totalorder %s839_s8, %s553_s12  ;;  %s627_s4 = smov [#allocation8]  }
  0x5b   : > { %v296_v6 = vadd.f32 %v295_v5, %v288_v4  ;;  %s557_s15 = sshll.u32 %s627_s4, 4  ;;  %s558_s15 = int_to_ptr.vmem [resolvable:$false] %s557_s15 }
  0x5c   : > { %v300_v7 = vstv %s299_s14  ;;  %p555_p7 = pnand %p554_p13, %p899_p3  ;;  %s559_s16 = scalar_lea.vmem %s558_s15, 256 }
  0x5d   : > { %297 = vadd.xlane.f32.xlu0 %v296_v6  ;;  %p560_p8 = scmp.lt.s32.totalorder %s839_s8, %s558_s15  ;;  %p561_p9 = scmp.lt.s32.totalorder %s559_s16, %s553_s12 }
  0x5e   : > { %p556_p5 = pneg %p555_p7 }
  0x5f   : > { %p562_p0 = por %p561_p9, %p560_p8 }
  0x61   : > { %p563_p1 = pnand %p562_p0, %p556_p5 }
  0xea   : > { %v298_v8 = vpop.xlane.xlu0 %297 }
  0xeb   : > { %v301_v9 = vadd.f32 %v300_v7, %v298_v8 }
  0xed   : > { %v433_v10 = vmul.f32 -1.442695, %v301_v9 }
  0xef   : > { %489 = vpow2.f32 %v433_v10 }
  0xf9   : > { %v490_v11 = vpop.eup %489 }
  0xfa   : > { %v305_v12 = vadd.f32 1.0, %v490_v11 }
  0xfc   : > { %491 = vrcp.f32 %v305_v12 }
 0x106   : > { %v492_v13 = vpop.eup %491 }
 0x107   : > { %v309_v14 = vsub.f32 1.0, %v492_v13  ;;  %v308_v15 = vmul.f32 %v492_v13, %v278_v0 }
 0x109   : > { %v310_v16 = vmul.f32 %v309_v14, %v279_v1 }
 0x10b   : > { %v311_v17 = vadd.f32 %v310_v16, %v308_v15 }
 0x10d   : > { %312 = vst [vmem:[%s277_s19] sm:$0xff] %v311_v17 }
 0x10e   : > { %566 = shalt.err (!%p563_p1)
}
 0x10f   : > { %s567_s29 = scalar_lea.hbm %s837_s26, 128  ;;  %s571_s11 = scalar_lea.hbm %s886_s5, 256 }
 0x110   : > { %p568_p11 = scmp.ne.s32.totalorder %s837_s26, %s567_s29  ;;  %p572_p4 = scmp.lt.u32.totalorder %s837_s26, %s886_s5 }
 0x111   : > { %p573_p10 = scmp.lt.u32.totalorder %s571_s11, %s567_s29  ;;  %p575_p13 = scmp.lt.u32.totalorder %s567_s29, %s837_s26 }
 0x112   : > { %p569_p12 = pnand %p568_p11, %p899_p3 }
 0x113   : > { %p574_p6 = por %p573_p10, %p572_p4 }
 0x114   : > { %p570_p2 = pneg %p569_p12 }
 0x115   : > { %p576_p7 = por %p575_p13, %p574_p6 }
 0x117   : > { %p577_p5 = pnand %p576_p7, %p570_p2 }
 0x119   : > { %580 = shalt.err (!%p577_p5)
}
 0x11a   : > { %442 = dma.vmem_to_hbm [thread:$0]  (%p899_p3), %s839_s8, 128, %s837_s26, %s314_s17  }
 0x11b PF: > { %s339_s14 = sand.u32 1, %s611_s20   ;;  %p900_p8 = scmp.ne.s32.totalorder %s892_s7, 0 }
 0x11c   : > { %p901_p9 = scmp.ge.s32.totalorder %s623_s23, 2  ;;  %s340_s30 = scalar_lea.sflag [#allocation5], %s339_s14 }
 0x11e   : > { %p452_p0 = pnand %p901_p9, %p900_p8 }
 0x120   : > { %606 = dma.done.wait (!%p452_p0), %s340_s30, 128  }
 0x121   : > { %608 = vsyncadd (!%p452_p0), %s340_s30, 4294967168  ;;  %p22_p1 = scmp.ge.s32.totalorder %s686_s25, 4   ;;  %s902_s20 = smov %s615_s21 }
 0x122   : > { %s903_s21 = smov %s619_s22  ;;  %s904_s22 = smov %s698_s28 }
 0x123   : > { %s905_s23 = smov %s686_s25  ;;  %24 = sbr.rel (!%p22_p1) target bundleno = 9 (0x9), region = 98 }
 0x12a   :  { %345 = vsyncpa [#allocation4], 1 }
 0x12b   :  { %347 = vsyncpa [#allocation4 + $0x1], 1 }
 0x12c   :  { %348 = vsyncpa [#allocation7], 1 }
 0x12d   :  { %350 = vsyncpa [#allocation7 + $0x1], 1 }
 0x12e   :  { %351 = vsyncpa [#allocation5], 1 }
 0x12f   :  { %353 = vsyncpa [#allocation5 + $0x1], 1 }

</bundles_post_ra>
